<compile_context>
chip_gen: v6e
topology: v6e:2x2x1
jax: 0.10.0
libtpu: 0.0.40
codegen_flags: <defaults>
</compile_context>

<pallas_src>
import jax
import jax.numpy as jnp
from jax import lax
from jax.experimental import pallas as pl
from jax.experimental.pallas import tpu as pltpu  # noqa: F401  (TPU backend)

# ---- problem sizes (small, consistent with the module defaults) ----
B = 2         # batch
S = 8         # sequence length
D = 32        # d_model
N_HEAD = 4    # n_head
DH = D // N_HEAD
FF = 8 * D    # dim_feedforward default = 8 * d_model
EPS = 1e-5
SCALE = 1.0 / (DH ** 0.5)


def _layernorm(x, gamma, beta):
    mu = jnp.mean(x, axis=-1, keepdims=True)
    var = jnp.mean((x - mu) ** 2, axis=-1, keepdims=True)
    return (x - mu) * lax.rsqrt(var + EPS) * gamma + beta


def transformer_layer_kernel(
    x_ref,                      # (B*S, D)      f32
    wqkv_ref, bqkv_ref,         # (D, 3D) bf16, (1, 3D) f32   (q part pre-scaled)
    wo_ref, bo_ref,             # (D, D)  bf16, (1, D)  f32
    g1_ref, t1_ref,             # (1, D)  f32   LayerNorm 1 (ResidualAttention.norm)
    w1_ref, b1_ref,             # (D, FF) bf16, (1, FF) f32
    w2_ref, b2_ref,             # (FF, D) bf16, (1, D)  f32
    g2_ref, t2_ref,             # (1, D)  f32   LayerNorm 2 (TransformerLayer.norm)
    o_ref,                      # (B*S, D)      f32
):
    x = x_ref[...]                                              # (B*S, D) f32

    # ----- fused QKV projection: one (B*S, D) x (D, 3D) MXU matmul -----
    qkv = jnp.dot(x.astype(jnp.bfloat16), wqkv_ref[...],
                  preferred_element_type=jnp.float32) + bqkv_ref[...]
    # softmax scale already folded into the q columns of wqkv / bqkv.
    q = qkv[:, 0 * D:1 * D].astype(jnp.bfloat16).reshape(B, S, D)
    k = qkv[:, 1 * D:2 * D].astype(jnp.bfloat16).reshape(B, S, D)
    v = qkv[:, 2 * D:3 * D].astype(jnp.bfloat16).reshape(B, S, D)

    # ----- multi-head self-attention (batched over B, heads unrolled) -----
    head_outs = []
    for h in range(N_HEAD):
        sl = slice(h * DH, (h + 1) * DH)
        qh, kh, vh = q[:, :, sl], k[:, :, sl], v[:, :, sl]      # (B, S, DH)
        s = jnp.einsum("bqd,bkd->bqk", qh, kh,
                       preferred_element_type=jnp.float32)      # (B, S, S)
        s = s - jnp.max(s, axis=-1, keepdims=True)
        p = jnp.exp(s)
        p = p * pl.reciprocal(jnp.sum(p, axis=-1, keepdims=True), approx=True)
        head_outs.append(
            jnp.einsum("bqk,bkd->bqd", p.astype(jnp.bfloat16), vh,
                       preferred_element_type=jnp.float32))     # (B, S, DH)
    attn = jnp.concatenate(head_outs, axis=-1).reshape(B * S, D)
    attn = jnp.dot(attn.astype(jnp.bfloat16), wo_ref[...],
                   preferred_element_type=jnp.float32) + bo_ref[...]

    # ----- residual + LayerNorm (norm_first=False; dropout = identity) -----
    y = _layernorm(x + attn, g1_ref[...], t1_ref[...])

    # ----- MLP: Linear(D->FF) -> ReLU -> Linear(FF->D) -----
    h1 = jnp.dot(y.astype(jnp.bfloat16), w1_ref[...],
                 preferred_element_type=jnp.float32) + b1_ref[...]
    h1 = jnp.maximum(h1, 0.0)
    z = jnp.dot(h1.astype(jnp.bfloat16), w2_ref[...],
                preferred_element_type=jnp.float32) + b2_ref[...]

    # ----- residual + final LayerNorm -----
    out = _layernorm(y + z, g2_ref[...], t2_ref[...])
    o_ref[...] = out.astype(o_ref.dtype)


def transformer_layer(tokens, params):
    """tokens: (B, S, D) float32; params: dict of f32 weights (see init_params)."""
    bf16 = jnp.bfloat16
    # Fuse q/k/v projections into one weight; fold 1/sqrt(DH) into the q part.
    wqkv = jnp.concatenate(
        [params["wq"] * SCALE, params["wk"], params["wv"]], axis=1).astype(bf16)
    bqkv = jnp.concatenate(
        [params["bq"] * SCALE, params["bk"], params["bv"]], axis=1)

    weights = [
        wqkv, bqkv,
        params["wo"].astype(bf16), params["bo"],
        params["g1"], params["t1"],
        params["w1"].astype(bf16), params["b1"],
        params["w2"].astype(bf16), params["b2"],
        params["g2"], params["t2"],
    ]

    x_flat = tokens.reshape(B * S, D)   # free bitcast; one sublane-dense slab
    out = pl.pallas_call(
        transformer_layer_kernel,
        out_shape=jax.ShapeDtypeStruct((B * S, D), tokens.dtype),
        # no grid: single invocation, whole arrays resident in VMEM,
        # every weight DMA'd exactly once.
    )(x_flat, *weights)
    return out.reshape(B, S, D)


def reference(tokens, p):
    """Pure-JAX f32 reference for the same forward pass (eval mode)."""
    x = tokens
    q = x @ p["wq"] + p["bq"]
    k = x @ p["wk"] + p["bk"]
    v = x @ p["wv"] + p["bv"]

    def split_heads(t):  # (B, S, D) -> (B, H, S, DH)
        return t.reshape(B, S, N_HEAD, DH).transpose(0, 2, 1, 3)

    qh, kh, vh = split_heads(q), split_heads(k), split_heads(v)
    s = jnp.einsum("bhqd,bhkd->bhqk", qh, kh) * SCALE
    p_attn = jax.nn.softmax(s, axis=-1)
    o = jnp.einsum("bhqk,bhkd->bhqd", p_attn, vh)
    o = o.transpose(0, 2, 1, 3).reshape(B, S, D)
    o = o @ p["wo"] + p["bo"]

    def ln(x_, g, t):
        mu = jnp.mean(x_, axis=-1, keepdims=True)
        var = jnp.mean((x_ - mu) ** 2, axis=-1, keepdims=True)
        return (x_ - mu) * lax.rsqrt(var + EPS) * g + t

    y = ln(x + o, p["g1"], p["t1"])
    h = jnp.maximum(y @ p["w1"] + p["b1"], 0.0)
    z = h @ p["w2"] + p["b2"]
    return ln(y + z, p["g2"], p["t2"])


def init_params(key):
    ks = jax.random.split(key, 8)
    sc = 0.1
    return {
        # attention in-proj (equivalent to nn.MultiheadAttention.in_proj split)
        "wq": jax.random.normal(ks[0], (D, D), jnp.float32) * sc,
        "wk": jax.random.normal(ks[1], (D, D), jnp.float32) * sc,
        "wv": jax.random.normal(ks[2], (D, D), jnp.float32) * sc,
        "bq": jax.random.normal(ks[3], (1, D), jnp.float32) * sc,
        "bk": jax.random.normal(ks[4], (1, D), jnp.float32) * sc,
        "bv": jax.random.normal(ks[5], (1, D), jnp.float32) * sc,
        # attention out-proj
        "wo": jax.random.normal(ks[6], (D, D), jnp.float32) * sc,
        "bo": jnp.zeros((1, D), jnp.float32),
        # LayerNorm 1 (PyTorch default init: ones / zeros)
        "g1": jnp.ones((1, D), jnp.float32),
        "t1": jnp.zeros((1, D), jnp.float32),
        # MLP
        "w1": jax.random.normal(ks[7], (D, FF), jnp.float32) * sc,
        "b1": jnp.zeros((1, FF), jnp.float32),
        "w2": jax.random.normal(jax.random.fold_in(key, 99), (FF, D), jnp.float32) * sc,
        "b2": jnp.zeros((1, D), jnp.float32),
        # LayerNorm 2
        "g2": jnp.ones((1, D), jnp.float32),
        "t2": jnp.zeros((1, D), jnp.float32),
    }


if __name__ == "__main__":
    key = jax.random.PRNGKey(0)
    k_x, k_p = jax.random.split(key)
    tokens = jax.random.normal(k_x, (B, S, D), jnp.float32)
    params = init_params(k_p)

    out = transformer_layer(tokens, params)
    out = jax.block_until_ready(out)

    ref = reference(tokens, params)
    assert out.shape == (B, S, D)
    # bf16 MXU operands + approx reciprocal -> loosened tolerance vs f32 reference.
    err = jnp.max(jnp.abs(out - ref))
    assert jnp.allclose(out, ref, atol=3e-2, rtol=3e-2), f"max abs err {err}"

    # TODO(synk): cross-attention branch, key_padding_mask and norm_first=True
    # paths of TransformerLayer are not exercised by the default forward and
    # are not implemented in the kernel.
    print("KERNEL_OK")
</pallas_src>

<mosaic_0001>
module attributes {stable_mosaic.version = 11 : i64} {
  func.func @transformer_layer_kernel(%arg0: memref<16x32xf32, #tpu.memory_space<vmem>>, %arg1: memref<32x96xbf16, #tpu.memory_space<vmem>>, %arg2: memref<1x96xf32, #tpu.memory_space<vmem>>, %arg3: memref<32x32xbf16, #tpu.memory_space<vmem>>, %arg4: memref<1x32xf32, #tpu.memory_space<vmem>>, %arg5: memref<1x32xf32, #tpu.memory_space<vmem>>, %arg6: memref<1x32xf32, #tpu.memory_space<vmem>>, %arg7: memref<32x256xbf16, #tpu.memory_space<vmem>>, %arg8: memref<1x256xf32, #tpu.memory_space<vmem>>, %arg9: memref<256x32xbf16, #tpu.memory_space<vmem>>, %arg10: memref<1x32xf32, #tpu.memory_space<vmem>>, %arg11: memref<1x32xf32, #tpu.memory_space<vmem>>, %arg12: memref<1x32xf32, #tpu.memory_space<vmem>>, %arg13: memref<16x32xf32, #tpu.memory_space<vmem>>) attributes {dimension_semantics = [], scalar_prefetch = 0 : i64, scratch_operands = 0 : i64, tpu.core_type = #tpu.core_type<tc>} {
    %c0 = arith.constant 0 : index
    %c0_0 = arith.constant 0 : index
    %0 = vector.load %arg0[%c0, %c0_0] : memref<16x32xf32, #tpu.memory_space<vmem>>, vector<16x32xf32>
    %1 = arith.truncf %0 : vector<16x32xf32> to vector<16x32xbf16>
    %c0_1 = arith.constant 0 : index
    %c0_2 = arith.constant 0 : index
    %2 = vector.load %arg1[%c0_1, %c0_2] : memref<32x96xbf16, #tpu.memory_space<vmem>>, vector<32x96xbf16>
    %cst = arith.constant dense<0.000000e+00> : vector<16x96xf32>
    %3 = tpu.matmul %1, %2, %cst {dimension_numbers = #tpu.dot_dimension_numbers<[1], [0], [0], [1], [0, 0, 1, 1], [], []>} : vector<16x32xbf16>, vector<32x96xbf16>, vector<16x96xf32> -> vector<16x96xf32>
    %c0_3 = arith.constant 0 : index
    %c0_4 = arith.constant 0 : index
    %4 = vector.load %arg2[%c0_3, %c0_4] : memref<1x96xf32, #tpu.memory_space<vmem>>, vector<1x96xf32>
    %5 = vector.broadcast %4 : vector<1x96xf32> to vector<16x96xf32>
    %6 = arith.addf %3, %5 : vector<16x96xf32>
    %7 = vector.extract_strided_slice %6 {offsets = [0, 0], sizes = [16, 32], strides = [1, 1]} : vector<16x96xf32> to vector<16x32xf32>
    %8 = arith.truncf %7 : vector<16x32xf32> to vector<16x32xbf16>
    %9 = vector.shape_cast %8 : vector<16x32xbf16> to vector<2x8x32xbf16>
    %10 = vector.extract_strided_slice %6 {offsets = [0, 32], sizes = [16, 32], strides = [1, 1]} : vector<16x96xf32> to vector<16x32xf32>
    %11 = arith.truncf %10 : vector<16x32xf32> to vector<16x32xbf16>
    %12 = vector.shape_cast %11 : vector<16x32xbf16> to vector<2x8x32xbf16>
    %13 = vector.extract_strided_slice %6 {offsets = [0, 64], sizes = [16, 32], strides = [1, 1]} : vector<16x96xf32> to vector<16x32xf32>
    %14 = arith.truncf %13 : vector<16x32xf32> to vector<16x32xbf16>
    %15 = vector.shape_cast %14 : vector<16x32xbf16> to vector<2x8x32xbf16>
    %16 = vector.extract_strided_slice %9 {offsets = [0, 0, 0], sizes = [2, 8, 8], strides = [1, 1, 1]} : vector<2x8x32xbf16> to vector<2x8x8xbf16>
    %17 = vector.extract_strided_slice %12 {offsets = [0, 0, 0], sizes = [2, 8, 8], strides = [1, 1, 1]} : vector<2x8x32xbf16> to vector<2x8x8xbf16>
    %18 = vector.extract_strided_slice %15 {offsets = [0, 0, 0], sizes = [2, 8, 8], strides = [1, 1, 1]} : vector<2x8x32xbf16> to vector<2x8x8xbf16>
    "tpu.trace_start"() <{level = 10 : i32, message = "bqd,bkd->bqk"}> : () -> ()
    %cst_5 = arith.constant dense<0.000000e+00> : vector<2x8x8xf32>
    %19 = tpu.matmul %16, %17, %cst_5 {dimension_numbers = #tpu.dot_dimension_numbers<[2], [2], [1], [1], [0, 0, 0, 1, 1, 1], [0], [0]>} : vector<2x8x8xbf16>, vector<2x8x8xbf16>, vector<2x8x8xf32> -> vector<2x8x8xf32>
    "tpu.trace_stop"() : () -> ()
    %cst_6 = arith.constant dense<0xFF800000> : vector<2x8xf32>
    %20 = vector.multi_reduction <maximumf>, %19, %cst_6 [2] : vector<2x8x8xf32> to vector<2x8xf32>
    %21 = vector.shape_cast %20 : vector<2x8xf32> to vector<2x8x1xf32>
    %22 = vector.broadcast %21 : vector<2x8x1xf32> to vector<2x8x8xf32>
    %23 = arith.subf %19, %22 : vector<2x8x8xf32>
    %24 = math.exp %23 : vector<2x8x8xf32>
    %cst_7 = arith.constant dense<0.000000e+00> : vector<2x8xf32>
    %25 = vector.multi_reduction <add>, %24, %cst_7 [2] : vector<2x8x8xf32> to vector<2x8xf32>
    %26 = vector.shape_cast %25 : vector<2x8xf32> to vector<2x8x1xf32>
    %27 = tpu.reciprocal %26 {approx = true} : vector<2x8x1xf32> -> vector<2x8x1xf32>
    %28 = vector.broadcast %27 : vector<2x8x1xf32> to vector<2x8x8xf32>
    %29 = arith.mulf %24, %28 : vector<2x8x8xf32>
    %30 = arith.truncf %29 : vector<2x8x8xf32> to vector<2x8x8xbf16>
    "tpu.trace_start"() <{level = 10 : i32, message = "bqk,bkd->bqd"}> : () -> ()
    %cst_8 = arith.constant dense<0.000000e+00> : vector<2x8x8xf32>
    %31 = tpu.matmul %30, %18, %cst_8 {dimension_numbers = #tpu.dot_dimension_numbers<[2], [1], [1], [2], [0, 0, 0, 1, 1, 2], [0], [0]>} : vector<2x8x8xbf16>, vector<2x8x8xbf16>, vector<2x8x8xf32> -> vector<2x8x8xf32>
    "tpu.trace_stop"() : () -> ()
    %32 = vector.extract_strided_slice %9 {offsets = [0, 0, 8], sizes = [2, 8, 8], strides = [1, 1, 1]} : vector<2x8x32xbf16> to vector<2x8x8xbf16>
    %33 = vector.extract_strided_slice %12 {offsets = [0, 0, 8], sizes = [2, 8, 8], strides = [1, 1, 1]} : vector<2x8x32xbf16> to vector<2x8x8xbf16>
    %34 = vector.extract_strided_slice %15 {offsets = [0, 0, 8], sizes = [2, 8, 8], strides = [1, 1, 1]} : vector<2x8x32xbf16> to vector<2x8x8xbf16>
    "tpu.trace_start"() <{level = 10 : i32, message = "bqd,bkd->bqk"}> : () -> ()
    %cst_9 = arith.constant dense<0.000000e+00> : vector<2x8x8xf32>
    %35 = tpu.matmul %32, %33, %cst_9 {dimension_numbers = #tpu.dot_dimension_numbers<[2], [2], [1], [1], [0, 0, 0, 1, 1, 1], [0], [0]>} : vector<2x8x8xbf16>, vector<2x8x8xbf16>, vector<2x8x8xf32> -> vector<2x8x8xf32>
    "tpu.trace_stop"() : () -> ()
    %cst_10 = arith.constant dense<0xFF800000> : vector<2x8xf32>
    %36 = vector.multi_reduction <maximumf>, %35, %cst_10 [2] : vector<2x8x8xf32> to vector<2x8xf32>
    %37 = vector.shape_cast %36 : vector<2x8xf32> to vector<2x8x1xf32>
    %38 = vector.broadcast %37 : vector<2x8x1xf32> to vector<2x8x8xf32>
    %39 = arith.subf %35, %38 : vector<2x8x8xf32>
    %40 = math.exp %39 : vector<2x8x8xf32>
    %cst_11 = arith.constant dense<0.000000e+00> : vector<2x8xf32>
    %41 = vector.multi_reduction <add>, %40, %cst_11 [2] : vector<2x8x8xf32> to vector<2x8xf32>
    %42 = vector.shape_cast %41 : vector<2x8xf32> to vector<2x8x1xf32>
    %43 = tpu.reciprocal %42 {approx = true} : vector<2x8x1xf32> -> vector<2x8x1xf32>
    %44 = vector.broadcast %43 : vector<2x8x1xf32> to vector<2x8x8xf32>
    %45 = arith.mulf %40, %44 : vector<2x8x8xf32>
    %46 = arith.truncf %45 : vector<2x8x8xf32> to vector<2x8x8xbf16>
    "tpu.trace_start"() <{level = 10 : i32, message = "bqk,bkd->bqd"}> : () -> ()
    %cst_12 = arith.constant dense<0.000000e+00> : vector<2x8x8xf32>
    %47 = tpu.matmul %46, %34, %cst_12 {dimension_numbers = #tpu.dot_dimension_numbers<[2], [1], [1], [2], [0, 0, 0, 1, 1, 2], [0], [0]>} : vector<2x8x8xbf16>, vector<2x8x8xbf16>, vector<2x8x8xf32> -> vector<2x8x8xf32>
    "tpu.trace_stop"() : () -> ()
    %48 = vector.extract_strided_slice %9 {offsets = [0, 0, 16], sizes = [2, 8, 8], strides = [1, 1, 1]} : vector<2x8x32xbf16> to vector<2x8x8xbf16>
    %49 = vector.extract_strided_slice %12 {offsets = [0, 0, 16], sizes = [2, 8, 8], strides = [1, 1, 1]} : vector<2x8x32xbf16> to vector<2x8x8xbf16>
    %50 = vector.extract_strided_slice %15 {offsets = [0, 0, 16], sizes = [2, 8, 8], strides = [1, 1, 1]} : vector<2x8x32xbf16> to vector<2x8x8xbf16>
    "tpu.trace_start"() <{level = 10 : i32, message = "bqd,bkd->bqk"}> : () -> ()
    %cst_13 = arith.constant dense<0.000000e+00> : vector<2x8x8xf32>
    %51 = tpu.matmul %48, %49, %cst_13 {dimension_numbers = #tpu.dot_dimension_numbers<[2], [2], [1], [1], [0, 0, 0, 1, 1, 1], [0], [0]>} : vector<2x8x8xbf16>, vector<2x8x8xbf16>, vector<2x8x8xf32> -> vector<2x8x8xf32>
    "tpu.trace_stop"() : () -> ()
    %cst_14 = arith.constant dense<0xFF800000> : vector<2x8xf32>
    %52 = vector.multi_reduction <maximumf>, %51, %cst_14 [2] : vector<2x8x8xf32> to vector<2x8xf32>
    %53 = vector.shape_cast %52 : vector<2x8xf32> to vector<2x8x1xf32>
    %54 = vector.broadcast %53 : vector<2x8x1xf32> to vector<2x8x8xf32>
    %55 = arith.subf %51, %54 : vector<2x8x8xf32>
    %56 = math.exp %55 : vector<2x8x8xf32>
    %cst_15 = arith.constant dense<0.000000e+00> : vector<2x8xf32>
    %57 = vector.multi_reduction <add>, %56, %cst_15 [2] : vector<2x8x8xf32> to vector<2x8xf32>
    %58 = vector.shape_cast %57 : vector<2x8xf32> to vector<2x8x1xf32>
    %59 = tpu.reciprocal %58 {approx = true} : vector<2x8x1xf32> -> vector<2x8x1xf32>
    %60 = vector.broadcast %59 : vector<2x8x1xf32> to vector<2x8x8xf32>
    %61 = arith.mulf %56, %60 : vector<2x8x8xf32>
    %62 = arith.truncf %61 : vector<2x8x8xf32> to vector<2x8x8xbf16>
    "tpu.trace_start"() <{level = 10 : i32, message = "bqk,bkd->bqd"}> : () -> ()
    %cst_16 = arith.constant dense<0.000000e+00> : vector<2x8x8xf32>
    %63 = tpu.matmul %62, %50, %cst_16 {dimension_numbers = #tpu.dot_dimension_numbers<[2], [1], [1], [2], [0, 0, 0, 1, 1, 2], [0], [0]>} : vector<2x8x8xbf16>, vector<2x8x8xbf16>, vector<2x8x8xf32> -> vector<2x8x8xf32>
    "tpu.trace_stop"() : () -> ()
    %64 = vector.extract_strided_slice %9 {offsets = [0, 0, 24], sizes = [2, 8, 8], strides = [1, 1, 1]} : vector<2x8x32xbf16> to vector<2x8x8xbf16>
    %65 = vector.extract_strided_slice %12 {offsets = [0, 0, 24], sizes = [2, 8, 8], strides = [1, 1, 1]} : vector<2x8x32xbf16> to vector<2x8x8xbf16>
    %66 = vector.extract_strided_slice %15 {offsets = [0, 0, 24], sizes = [2, 8, 8], strides = [1, 1, 1]} : vector<2x8x32xbf16> to vector<2x8x8xbf16>
    "tpu.trace_start"() <{level = 10 : i32, message = "bqd,bkd->bqk"}> : () -> ()
    %cst_17 = arith.constant dense<0.000000e+00> : vector<2x8x8xf32>
    %67 = tpu.matmul %64, %65, %cst_17 {dimension_numbers = #tpu.dot_dimension_numbers<[2], [2], [1], [1], [0, 0, 0, 1, 1, 1], [0], [0]>} : vector<2x8x8xbf16>, vector<2x8x8xbf16>, vector<2x8x8xf32> -> vector<2x8x8xf32>
    "tpu.trace_stop"() : () -> ()
    %cst_18 = arith.constant dense<0xFF800000> : vector<2x8xf32>
    %68 = vector.multi_reduction <maximumf>, %67, %cst_18 [2] : vector<2x8x8xf32> to vector<2x8xf32>
    %69 = vector.shape_cast %68 : vector<2x8xf32> to vector<2x8x1xf32>
    %70 = vector.broadcast %69 : vector<2x8x1xf32> to vector<2x8x8xf32>
    %71 = arith.subf %67, %70 : vector<2x8x8xf32>
    %72 = math.exp %71 : vector<2x8x8xf32>
    %cst_19 = arith.constant dense<0.000000e+00> : vector<2x8xf32>
    %73 = vector.multi_reduction <add>, %72, %cst_19 [2] : vector<2x8x8xf32> to vector<2x8xf32>
    %74 = vector.shape_cast %73 : vector<2x8xf32> to vector<2x8x1xf32>
    %75 = tpu.reciprocal %74 {approx = true} : vector<2x8x1xf32> -> vector<2x8x1xf32>
    %76 = vector.broadcast %75 : vector<2x8x1xf32> to vector<2x8x8xf32>
    %77 = arith.mulf %72, %76 : vector<2x8x8xf32>
    %78 = arith.truncf %77 : vector<2x8x8xf32> to vector<2x8x8xbf16>
    "tpu.trace_start"() <{level = 10 : i32, message = "bqk,bkd->bqd"}> : () -> ()
    %cst_20 = arith.constant dense<0.000000e+00> : vector<2x8x8xf32>
    %79 = tpu.matmul %78, %66, %cst_20 {dimension_numbers = #tpu.dot_dimension_numbers<[2], [1], [1], [2], [0, 0, 0, 1, 1, 2], [0], [0]>} : vector<2x8x8xbf16>, vector<2x8x8xbf16>, vector<2x8x8xf32> -> vector<2x8x8xf32>
    "tpu.trace_stop"() : () -> ()
    %80 = tpu.concatenate %31, %47, %63, %79 in 2 : vector<2x8x8xf32>, vector<2x8x8xf32>, vector<2x8x8xf32>, vector<2x8x8xf32> -> vector<2x8x32xf32>
    %81 = vector.shape_cast %80 : vector<2x8x32xf32> to vector<16x32xf32>
    %82 = arith.truncf %81 : vector<16x32xf32> to vector<16x32xbf16>
    %c0_21 = arith.constant 0 : index
    %c0_22 = arith.constant 0 : index
    %83 = vector.load %arg3[%c0_21, %c0_22] : memref<32x32xbf16, #tpu.memory_space<vmem>>, vector<32x32xbf16>
    %cst_23 = arith.constant dense<0.000000e+00> : vector<16x32xf32>
    %84 = tpu.matmul %82, %83, %cst_23 {dimension_numbers = #tpu.dot_dimension_numbers<[1], [0], [0], [1], [0, 0, 1, 1], [], []>} : vector<16x32xbf16>, vector<32x32xbf16>, vector<16x32xf32> -> vector<16x32xf32>
    %c0_24 = arith.constant 0 : index
    %c0_25 = arith.constant 0 : index
    %85 = vector.load %arg4[%c0_24, %c0_25] : memref<1x32xf32, #tpu.memory_space<vmem>>, vector<1x32xf32>
    %86 = vector.broadcast %85 : vector<1x32xf32> to vector<16x32xf32>
    %87 = arith.addf %84, %86 : vector<16x32xf32>
    %88 = arith.addf %0, %87 : vector<16x32xf32>
    %c0_26 = arith.constant 0 : index
    %c0_27 = arith.constant 0 : index
    %89 = vector.load %arg5[%c0_26, %c0_27] : memref<1x32xf32, #tpu.memory_space<vmem>>, vector<1x32xf32>
    %c0_28 = arith.constant 0 : index
    %c0_29 = arith.constant 0 : index
    %90 = vector.load %arg6[%c0_28, %c0_29] : memref<1x32xf32, #tpu.memory_space<vmem>>, vector<1x32xf32>
    %cst_30 = arith.constant dense<0.000000e+00> : vector<16xf32>
    %91 = vector.multi_reduction <add>, %88, %cst_30 [1] : vector<16x32xf32> to vector<16xf32>
    %92 = vector.shape_cast %91 : vector<16xf32> to vector<16x1xf32>
    %cst_31 = arith.constant 3.200000e+01 : f32
    %93 = vector.broadcast %cst_31 : f32 to vector<16x1xf32>
    %94 = arith.divf %92, %93 : vector<16x1xf32>
    %95 = vector.broadcast %94 : vector<16x1xf32> to vector<16x32xf32>
    %96 = arith.subf %88, %95 : vector<16x32xf32>
    %97 = arith.mulf %96, %96 : vector<16x32xf32>
    %cst_32 = arith.constant dense<0.000000e+00> : vector<16xf32>
    %98 = vector.multi_reduction <add>, %97, %cst_32 [1] : vector<16x32xf32> to vector<16xf32>
    %99 = vector.shape_cast %98 : vector<16xf32> to vector<16x1xf32>
    %cst_33 = arith.constant 3.200000e+01 : f32
    %100 = vector.broadcast %cst_33 : f32 to vector<16x1xf32>
    %101 = arith.divf %99, %100 : vector<16x1xf32>
    %102 = vector.broadcast %94 : vector<16x1xf32> to vector<16x32xf32>
    %103 = arith.subf %88, %102 : vector<16x32xf32>
    %cst_34 = arith.constant 9.99999974E-6 : f32
    %104 = vector.broadcast %cst_34 : f32 to vector<16x1xf32>
    %105 = arith.addf %101, %104 : vector<16x1xf32>
    %106 = math.rsqrt %105 : vector<16x1xf32>
    %107 = vector.broadcast %106 : vector<16x1xf32> to vector<16x32xf32>
    %108 = arith.mulf %103, %107 : vector<16x32xf32>
    %109 = vector.broadcast %89 : vector<1x32xf32> to vector<16x32xf32>
    %110 = arith.mulf %108, %109 : vector<16x32xf32>
    %111 = vector.broadcast %90 : vector<1x32xf32> to vector<16x32xf32>
    %112 = arith.addf %110, %111 : vector<16x32xf32>
    %113 = arith.truncf %112 : vector<16x32xf32> to vector<16x32xbf16>
    %c0_35 = arith.constant 0 : index
    %c0_36 = arith.constant 0 : index
    %114 = vector.load %arg7[%c0_35, %c0_36] : memref<32x256xbf16, #tpu.memory_space<vmem>>, vector<32x256xbf16>
    %cst_37 = arith.constant dense<0.000000e+00> : vector<16x256xf32>
    %115 = tpu.matmul %113, %114, %cst_37 {dimension_numbers = #tpu.dot_dimension_numbers<[1], [0], [0], [1], [0, 0, 1, 1], [], []>} : vector<16x32xbf16>, vector<32x256xbf16>, vector<16x256xf32> -> vector<16x256xf32>
    %c0_38 = arith.constant 0 : index
    %c0_39 = arith.constant 0 : index
    %116 = vector.load %arg8[%c0_38, %c0_39] : memref<1x256xf32, #tpu.memory_space<vmem>>, vector<1x256xf32>
    %117 = vector.broadcast %116 : vector<1x256xf32> to vector<16x256xf32>
    %118 = arith.addf %115, %117 : vector<16x256xf32>
    %cst_40 = arith.constant 0.000000e+00 : f32
    %119 = vector.broadcast %cst_40 : f32 to vector<16x256xf32>
    %120 = arith.maximumf %118, %119 : vector<16x256xf32>
    %121 = arith.truncf %120 : vector<16x256xf32> to vector<16x256xbf16>
    %c0_41 = arith.constant 0 : index
    %c0_42 = arith.constant 0 : index
    %122 = vector.load %arg9[%c0_41, %c0_42] : memref<256x32xbf16, #tpu.memory_space<vmem>>, vector<256x32xbf16>
    %cst_43 = arith.constant dense<0.000000e+00> : vector<16x32xf32>
    %123 = tpu.matmul %121, %122, %cst_43 {dimension_numbers = #tpu.dot_dimension_numbers<[1], [0], [0], [1], [0, 0, 1, 1], [], []>} : vector<16x256xbf16>, vector<256x32xbf16>, vector<16x32xf32> -> vector<16x32xf32>
    %c0_44 = arith.constant 0 : index
    %c0_45 = arith.constant 0 : index
    %124 = vector.load %arg10[%c0_44, %c0_45] : memref<1x32xf32, #tpu.memory_space<vmem>>, vector<1x32xf32>
    %125 = vector.broadcast %124 : vector<1x32xf32> to vector<16x32xf32>
    %126 = arith.addf %123, %125 : vector<16x32xf32>
    %127 = arith.addf %112, %126 : vector<16x32xf32>
    %c0_46 = arith.constant 0 : index
    %c0_47 = arith.constant 0 : index
    %128 = vector.load %arg11[%c0_46, %c0_47] : memref<1x32xf32, #tpu.memory_space<vmem>>, vector<1x32xf32>
    %c0_48 = arith.constant 0 : index
    %c0_49 = arith.constant 0 : index
    %129 = vector.load %arg12[%c0_48, %c0_49] : memref<1x32xf32, #tpu.memory_space<vmem>>, vector<1x32xf32>
    %cst_50 = arith.constant dense<0.000000e+00> : vector<16xf32>
    %130 = vector.multi_reduction <add>, %127, %cst_50 [1] : vector<16x32xf32> to vector<16xf32>
    %131 = vector.shape_cast %130 : vector<16xf32> to vector<16x1xf32>
    %cst_51 = arith.constant 3.200000e+01 : f32
    %132 = vector.broadcast %cst_51 : f32 to vector<16x1xf32>
    %133 = arith.divf %131, %132 : vector<16x1xf32>
    %134 = vector.broadcast %133 : vector<16x1xf32> to vector<16x32xf32>
    %135 = arith.subf %127, %134 : vector<16x32xf32>
    %136 = arith.mulf %135, %135 : vector<16x32xf32>
    %cst_52 = arith.constant dense<0.000000e+00> : vector<16xf32>
    %137 = vector.multi_reduction <add>, %136, %cst_52 [1] : vector<16x32xf32> to vector<16xf32>
    %138 = vector.shape_cast %137 : vector<16xf32> to vector<16x1xf32>
    %cst_53 = arith.constant 3.200000e+01 : f32
    %139 = vector.broadcast %cst_53 : f32 to vector<16x1xf32>
    %140 = arith.divf %138, %139 : vector<16x1xf32>
    %141 = vector.broadcast %133 : vector<16x1xf32> to vector<16x32xf32>
    %142 = arith.subf %127, %141 : vector<16x32xf32>
    %cst_54 = arith.constant 9.99999974E-6 : f32
    %143 = vector.broadcast %cst_54 : f32 to vector<16x1xf32>
    %144 = arith.addf %140, %143 : vector<16x1xf32>
    %145 = math.rsqrt %144 : vector<16x1xf32>
    %146 = vector.broadcast %145 : vector<16x1xf32> to vector<16x32xf32>
    %147 = arith.mulf %142, %146 : vector<16x32xf32>
    %148 = vector.broadcast %128 : vector<1x32xf32> to vector<16x32xf32>
    %149 = arith.mulf %147, %148 : vector<16x32xf32>
    %150 = vector.broadcast %129 : vector<1x32xf32> to vector<16x32xf32>
    %151 = arith.addf %149, %150 : vector<16x32xf32>
    %c0_55 = arith.constant 0 : index
    %c0_56 = arith.constant 0 : index
    %152 = vector.load %arg13[%c0_55, %c0_56] : memref<16x32xf32, #tpu.memory_space<vmem>>, vector<16x32xf32>
    tpu.vector_store %arg13[%c0_55, %c0_56], %151 {strides = array<i32>} : memref<16x32xf32, #tpu.memory_space<vmem>>, vector<16x32xf32>,
    return
  }
}

</mosaic_0001>

<bundles_post_ra>
// kernel: tpu_custom_call.1
= control target key start
LH: loop header
LB: loop body
LE: loop exit
PB: predicated region body
PF: predicated region fallthrough
CT: control target
= control target key end

     0   :  { %v1825_v1 = vmov 0.0   ;;  %vm1826_vm0 = vmmov 0   ;;  %vm72_vm1 = vcmask 261120   ;;  %s2191_s0 = inlined_call_operand.vmem [shape: f32[16,32], index: 0, kind: input, shape index: {}]   ;;  %s2192_s1 = inlined_call_operand.vmem [shape: bf16[32,96], index: 1, kind: input, shape index: {}]   ;;  %s2193_s2 = inlined_call_operand.vmem [shape: f32[1,96], index: 2, kind: input, shape index: {}]   ;;  %s2194_s3 = inlined_call_operand.vmem [shape: bf16[32,32], index: 3, kind: input, shape index: {}]   ;;  %s2195_s4 = inlined_call_operand.vmem [shape: f32[1,32], index: 4, kind: input, shape index: {}]   ;;  %s2196_s5 = inlined_call_operand.vmem [shape: f32[1,32], index: 5, kind: input, shape index: {}]   ;;  %s2197_s6 = inlined_call_operand.vmem [shape: f32[1,32], index: 6, kind: input, shape index: {}]   ;;  %s2198_s7 = inlined_call_operand.vmem [shape: bf16[32,256], index: 7, kind: input, shape index: {}]   ;;  %s2199_s8 = inlined_call_operand.vmem [shape: f32[1,256], index: 8, kind: input, shape index: {}]   ;;  %s2200_s9 = inlined_call_operand.vmem [shape: bf16[256,32], index: 9, kind: input, shape index: {}]   ;;  %s2201_s10 = inlined_call_operand.vmem [shape: f32[1,32], index: 10, kind: input, shape index: {}]   ;;  %s2202_s11 = inlined_call_operand.vmem [shape: f32[1,32], index: 11, kind: input, shape index: {}]   ;;  %s2203_s12 = inlined_call_operand.vmem [shape: f32[1,32], index: 12, kind: input, shape index: {}]   ;;  %s2204_s13 = inlined_call_operand.hbm [shape: f32[16,32], index: 13, kind: output, shape index: {}]  }
   0x1   :  { %v1737_v0 = vld [vmem:[%s2192_s1 + $0x8] sm:$0xff]   ;;  %1591 = vmatprep.subr.bf16.mxu0 %v1825_v1  ;;  %1611 = vmatprep.subr.bf16.mxu1 %v1825_v1  ;;  %v1738_v2 = vld [vmem:[%s2192_s1] sm:$0xff]  }
   0x2   :  { %1592 = vmatpush3.bf16.msra.mxu0 %v1737_v0  ;;  %1595 = vmatprep.mubr.msk.bf16.mxu0 %vm1826_vm0, %v1825_v1  ;;  %v1927_v3 = vld [vmem:[%s2191_s0] sm:$0xff]  ;;  %v1932_v4 = vld [vmem:[%s2191_s0 + $0x8] sm:$0xff] }
   0x3   :  { %1593 = vmatprep.subr.bf16.mxu0 %v1825_v1  ;;  %1613 = vmatprep.mubr.msk.bf16.mxu1 %vm1826_vm0, %v1825_v1  ;;  %v48_v5 = vpack.c.bf16 %v1932_v4, %v1927_v3 }
   0x6   :  { %1594 = vmatpush3.bf16.msra.mxu0 %v1738_v2 }
   0x7   :  { %1599 = vmatprep.subr.bf16.mxu0 %v1825_v1 }
   0x9   :  { %1596 = vmatmul.mubr.msk.bf16.vlgmr.msra.gmra.mxu0 %vm72_vm1, %v48_v5 }
   0xa   :  { %1601 = vmatprep.mubr.msk.bf16.mxu0 %vm1826_vm0, %v1825_v1 }
   0xb   :  { %18 = vsyncpa [#allocation3], 0  ;;  %v1477_v6 = vld [vmem:[%s2193_s2] ss:$0 sm:$0xff]  ;;  %s1827_s16 = smov 96   ;;  %vm125_vm2 = vcmask 64512  }
   0xc   :  { %s1828_s2 = smov 64   ;;  %s1829_s17 = smov 88   ;;  %vm249_vm3 = vcmask 1043456   ;;  %vm1027_vm4 = vcmask 130048   ;;  %vm1030_vm5 = vcmask 195584  }
   0xd   :  { %s1830_s18 = smov 120   ;;  %s1831_s19 = smov 56  }
   0xe   :  { %s1832_s20 = smov 80   ;;  %s1833_s21 = smov 112  }
   0xf   :  { %s1834_s22 = smov 48   ;;  %s1835_s23 = smov 72  }
  0x10   :  { %s1836_s24 = smov 104   ;;  %s1837_s25 = smov 40  }
  0x11   :  { %s1838_s26 = smov 8   ;;  %s1839_s27 = smov 16  }
  0x12   :  { %s1840_s15 = smov 24  }
  0xc9   :  { %v110_v7 = vpop.f32.mrf.mxu0 }
  0xca   :  { %v111_v8 = vadd.f32 %v1477_v6, %v110_v7 }
  0xcb   :  { %v1597_v9 = vpop.f32.mrf.mxu0 }
  0xcc   :  { %v1946_v10 = vpack.c.bf16 %v111_v8, %v111_v8 }
  0xcd   :  { %v113_v11 = vpop.f32.mrf.mxu0 }
  0xce   :  { %v114_v12 = vadd.f32 %v1477_v6, %v113_v11  ;;  %123 = vrot.lane.b32.xlu0 %v1946_v10, %s1827_s16 }
  0xcf   :  { %v1598_v13 = vpop.f32.mrf.mxu0 }
  0xd0   :  { %v1949_v14 = vpack.c.bf16 %v114_v12, %v114_v12 }
  0xd2   :  { %172 = vrot.lane.b32.xlu0 %v1949_v14, %s1827_s16 }
 0x140   :  { %v124_v15 = vpop.permute.xlu0 %123 }
 0x141   :  { %v130_v16 = vsel %vm125_vm2, %v124_v15, 0 }
 0x142   :  { %1600 = vmatpush3.bf16.xpose.msra.mxu0 %v130_v16 }
 0x143   :  { %1605 = vmatprep.subr.bf16.mxu0 %v1825_v1 }
 0x144   :  { %v173_v17 = vpop.permute.xlu0 %172 }
 0x145   :  { %v178_v18 = vsel %vm125_vm2, %v173_v17, 0 }
 0x149   :  { %1602 = vmatmul.mubr.msk.bf16.vlgmr.msra.gmra.mxu0 %vm125_vm2, %v1946_v10 }
 0x14a   :  { %1606 = vmatpush3.bf16.xpose.msra.mxu0 %v178_v18  ;;  %1607 = vmatprep.mubr.msk.bf16.mxu0 %vm1826_vm0, %v1825_v1 }
 0x14b   :  { %1617 = vmatprep.subr.bf16.mxu0 %v1825_v1 }
 0x151   :  { %1608 = vmatmul.mubr.msk.bf16.vlgmr.msra.gmra.mxu0 %vm125_vm2, %v1949_v14 }
 0x152   :  { %1619 = vmatprep.mubr.msk.bf16.mxu0 %vm1826_vm0, %v1825_v1 }
 0x209   :  { %v166_v19 = vpop.f32.mrf.mxu0 }
 0x20a   :  { %v220_v20 = vsel %vm125_vm2, %v166_v19, -inf }
 0x20b   :  { %221 = vmax.xlane.f32.xlu1 %v220_v20  ;;  %v1603_v21 = vpop.f32.mrf.mxu0 }
 0x20d   :  { %v169_v22 = vpop.f32.mrf.mxu0 }
 0x20f   :  { %v1604_v23 = vpop.f32.mrf.mxu0 }
 0x211   :  { %v214_v24 = vpop.f32.mrf.mxu0 }
 0x212   :  { %v223_v25 = vsel %vm125_vm2, %v214_v24, -inf }
 0x213   :  { %224 = vmax.xlane.f32.xlu1 %v223_v25  ;;  %v1609_v26 = vpop.f32.mrf.mxu0 }
 0x215   :  { %v217_v27 = vpop.f32.mrf.mxu0 }
 0x217   :  { %v1610_v28 = vpop.f32.mrf.mxu0 }
 0x224   :  { %244 = vrot.lane.b32.xlu1 %v1946_v10, %s1828_s2 }
 0x228   :  { %293 = vrot.lane.b32.xlu1 %v1949_v14, %s1828_s2  ;;  %s1842_s2 = smov [#allocation2]  }
 0x22c   :  { %343 = vrot.lane.b32.xlu1 %v1946_v10, %s1829_s17 }
 0x294   :  { %v222_v29 = vpop.xlane.xlu1 %221 }
 0x295   :  { %v226_v30 = vsub.f32 %v166_v19, %v222_v29 }
 0x297   :  { %v228_v31 = vmul.f32 1.442695, %v226_v30 }
 0x299   :  { %1763 = vpow2.f32 %v228_v31 }
 0x29c   :  { %v225_v32 = vpop.xlane.xlu1 %224 }
 0x29d   :  { %v227_v33 = vsub.f32 %v214_v24, %v225_v32 }
 0x29f   :  { %v230_v34 = vmul.f32 1.442695, %v227_v33 }
 0x2a0   :  { %v245_v35 = vpop.permute.xlu1 %244 }
 0x2a1   :  { %1765 = vpow2.f32 %v230_v34  ;;  %v251_v36 = vsel %vm249_vm3, %v245_v35, 0 }
 0x2a2   :  { %1612 = vmatpush3.bf16.msra.mxu1 %v251_v36 }
 0x2a3   :  { %1623 = vmatprep.subr.bf16.mxu1 %v1825_v1 }
 0x2a4   :  { %v294_v37 = vpop.permute.xlu1 %293 }
 0x2a5   :  { %v299_v38 = vsel %vm249_vm3, %v294_v37, 0 }
 0x2a6   :  { %v1764_v39 = vpop.eup %1763  ;;  %1618 = vmatpush3.bf16.msra.mxu0 %v299_v38 }
 0x2a7   :  { %v232_v40 = vsel %vm125_vm2, %v1764_v39, 0.0  ;;  %1629 = vmatprep.subr.bf16.mxu0 %v1825_v1 }
 0x2a8   :  { %233 = vadd.xlane.f32.xlu0 %v232_v40  ;;  %v344_v44 = vpop.permute.xlu1 %343 }
 0x2a9   :  { %v349_v49 = vsel %vm125_vm2, %v344_v44, 0 }
 0x2ae   :  { %v1766_v41 = vpop.eup %1765 }
 0x2af   :  { %v235_v42 = vsel %vm125_vm2, %v1766_v41, 0.0 }
 0x2b0   :  { %236 = vadd.xlane.f32.xlu1 %v235_v42 }
 0x2be   :  { %341 = vrot.lane.b32.xlu0 %v1946_v10, %s1830_s18 }
 0x2c1   :  { %393 = vrot.lane.b32.xlu1 %v1949_v14, %s1829_s17  ;;  %s1466_s17 = sshll.u32 %s1842_s2, 4  ;;  %s1467_s17 = int_to_ptr.vmem [resolvable:$true] %s1466_s17 }
 0x2c2   :  { %p1808_p1 = scmp.lt.s32.totalorder %s1467_s17, %s1467_s17 }
 0x2c5   :  { %391 = vrot.lane.b32.xlu1 %v1949_v14, %s1830_s18  ;;  %s1803_s18 = scalar_lea.vmem %s1467_s17, 256 }
 0x2c6   :  { %p1804_p0 = scmp.ne.s32.totalorder %s1467_s17, %s1803_s18  ;;  %p1809_p2 = scmp.lt.s32.totalorder %s1803_s18, %s1803_s18 }
 0x2c8   :  { %p1810_p3 = por %p1809_p2, %p1808_p1 }
 0x2ca   :  { %p1811_p4 = pnand %p1810_p3, %p1804_p0 }
 0x331   :  { %v234_v43 = vpop.xlane.xlu0 %233 }
 0x332   :  { %1767 = vrcp.f32 %v234_v43 }
 0x335   :  { %v342_v54 = vpop.permute.xlu0 %341 }
 0x339   :  { %v237_v45 = vpop.xlane.xlu1 %236 }
 0x33a   :  { %1769 = vrcp.f32 %v237_v45 }
 0x33d   :  { %v394_v52 = vpop.permute.xlu1 %393 }
 0x33e   :  { %v399_v55 = vsel %vm125_vm2, %v394_v52, 0 }
 0x33f   :  { %v1768_v46 = vpop.eup %1767 }
 0x340   :  { %v240_v47 = vmul.f32 %v1768_v46, %v1764_v39 }
 0x341   :  { %v392_v56 = vpop.permute.xlu1 %391 }
 0x342   :  { %v242_v48 = vpack.c.bf16 %v240_v47, %v240_v47 }
 0x344   :  { %1614 = vmatmul.mubr.msk.bf16.vlgmr.msra.gmra.mxu1 %vm125_vm2, %v242_v48 }
 0x345   :  { %1624 = vmatpush3.bf16.xpose.msra.mxu1 %v349_v49  ;;  %1625 = vmatprep.mubr.msk.bf16.mxu1 %vm1826_vm0, %v1825_v1 }
 0x346   :  { %1635 = vmatprep.subr.bf16.mxu1 %v1825_v1 }
 0x347   :  { %v1770_v50 = vpop.eup %1769 }
 0x348   :  { %v241_v51 = vmul.f32 %v1770_v50, %v1766_v41 }
 0x34a   :  { %v243_v53 = vpack.c.bf16 %v241_v51, %v241_v51 }
 0x34c   :  { %1620 = vmatmul.mubr.msk.bf16.vlgmr.msra.gmra.mxu0 %vm125_vm2, %v243_v53  ;;  %1626 = vmatmul.mubr.msk.bf16.vlgmr.msra.gmra.mxu1 %vm125_vm2, %v342_v54 }
 0x34d   :  { %1630 = vmatpush3.bf16.xpose.msra.mxu0 %v399_v55  ;;  %1631 = vmatprep.mubr.msk.bf16.mxu0 %vm1826_vm0, %v1825_v1 }
 0x34e   :  { %1641 = vmatprep.subr.bf16.mxu0 %v1825_v1  ;;  %1637 = vmatprep.mubr.msk.bf16.mxu1 %vm1826_vm0, %v1825_v1 }
 0x354   :  { %1632 = vmatmul.mubr.msk.bf16.vlgmr.msra.gmra.mxu0 %vm125_vm2, %v392_v56 }
 0x355   :  { %1643 = vmatprep.mubr.msk.bf16.mxu0 %vm1826_vm0, %v1825_v1 }
 0x404   :  { %v1994_v57 = vpop.f32.mrf.mxu1 }
 0x406   :  { %v1615_v58 = vpop.f32.mrf.mxu1 }
 0x408   :  { %v290_v59 = vpop.f32.mrf.mxu1 }
 0x40a   :  { %v1616_v60 = vpop.f32.mrf.mxu1 }
 0x40c   :  { %v1996_v61 = vpop.f32.mrf.mxu0  ;;  %v385_v62 = vpop.f32.mrf.mxu1 }
 0x40d   :  { %v441_v63 = vsel %vm125_vm2, %v385_v62, -inf }
 0x40e   :  { %442 = vmax.xlane.f32.xlu1 %v441_v63  ;;  %v1621_v0 = vpop.f32.mrf.mxu0  ;;  %v1627_v2 = vpop.f32.mrf.mxu1 }
 0x410   :  { %v338_v5 = vpop.f32.mrf.mxu0  ;;  %v388_v6 = vpop.f32.mrf.mxu1 }
 0x412   :  { %v1622_v7 = vpop.f32.mrf.mxu0  ;;  %v1628_v8 = vpop.f32.mrf.mxu1 }
 0x414   :  { %v435_v9 = vpop.f32.mrf.mxu0 }
 0x415   :  { %v444_v11 = vsel %vm125_vm2, %v435_v9, -inf }
 0x416   :  { %445 = vmax.xlane.f32.xlu0 %v444_v11  ;;  %v1633_v12 = vpop.f32.mrf.mxu0 }
 0x418   :  { %v438_v13 = vpop.f32.mrf.mxu0 }
 0x41a   :  { %v1634_v15 = vpop.f32.mrf.mxu0 }
 0x41f   :  { %465 = vrot.lane.b32.xlu1 %v1946_v10, %s1831_s19 }
 0x423   :  { %563 = vrot.lane.b32.xlu1 %v1946_v10, %s1832_s20 }
 0x42c   :  { %513 = vrot.lane.b32.xlu0 %v1949_v14, %s1831_s19 }
 0x430   :  { %561 = vrot.lane.b32.xlu0 %v1946_v10, %s1833_s21 }
 0x497   :  { %v443_v16 = vpop.xlane.xlu1 %442 }
 0x498   :  { %v447_v17 = vsub.f32 %v385_v62, %v443_v16 }
 0x49a   :  { %v449_v18 = vmul.f32 1.442695, %v447_v17 }
 0x49b   :  { %v466_v19 = vpop.permute.xlu1 %465 }
 0x49c   :  { %1771 = vpow2.f32 %v449_v18  ;;  %v471_v20 = vsel %vm249_vm3, %v466_v19, 0 }
 0x49d   :  { %1636 = vmatpush3.bf16.msra.mxu1 %v471_v20 }
 0x49e   :  { %1647 = vmatprep.subr.bf16.mxu1 %v1825_v1 }
 0x49f   :  { %v446_v21 = vpop.xlane.xlu0 %445  ;;  %v564_v30 = vpop.permute.xlu1 %563 }
 0x4a0   :  { %v448_v22 = vsub.f32 %v435_v9, %v446_v21  ;;  %v569_v36 = vsel %vm125_vm2, %v564_v30, 0 }
 0x4a2   :  { %v451_v23 = vmul.f32 1.442695, %v448_v22 }
 0x4a3   :  { %v514_v24 = vpop.permute.xlu0 %513 }
 0x4a4   :  { %1773 = vpow2.f32 %v451_v23  ;;  %v519_v25 = vsel %vm249_vm3, %v514_v24, 0 }
 0x4a5   :  { %1642 = vmatpush3.bf16.msra.mxu0 %v519_v25 }
 0x4a6   :  { %1653 = vmatprep.subr.bf16.mxu0 %v1825_v1 }
 0x4a7   :  { %v562_v41 = vpop.permute.xlu0 %561 }
 0x4a9   :  { %v1772_v26 = vpop.eup %1771 }
 0x4aa   :  { %v453_v27 = vsel %vm125_vm2, %v1772_v26, 0.0 }
 0x4ab   :  { %454 = vadd.xlane.f32.xlu1 %v453_v27 }
 0x4b1   :  { %v1774_v28 = vpop.eup %1773 }
 0x4b2   :  { %v456_v29 = vsel %vm125_vm2, %v1774_v28, 0.0 }
 0x4b3   :  { %457 = vadd.xlane.f32.xlu1 %v456_v29 }
 0x4c4   :  { %613 = vrot.lane.b32.xlu1 %v1949_v14, %s1832_s20 }
 0x4c8   :  { %611 = vrot.lane.b32.xlu1 %v1949_v14, %s1833_s21 }
 0x534   :  { %v455_v31 = vpop.xlane.xlu1 %454 }
 0x535   :  { %1775 = vrcp.f32 %v455_v31 }
 0x53c   :  { %v458_v32 = vpop.xlane.xlu1 %457 }
 0x53d   :  { %1777 = vrcp.f32 %v458_v32 }
 0x540   :  { %v614_v39 = vpop.permute.xlu1 %613 }
 0x541   :  { %v619_v42 = vsel %vm125_vm2, %v614_v39, 0 }
 0x542   :  { %v1776_v33 = vpop.eup %1775 }
 0x543   :  { %v461_v34 = vmul.f32 %v1776_v33, %v1772_v26 }
 0x544   :  { %v612_v43 = vpop.permute.xlu1 %611 }
 0x545   :  { %v463_v35 = vpack.c.bf16 %v461_v34, %v461_v34 }
 0x547   :  { %1638 = vmatmul.mubr.msk.bf16.vlgmr.msra.gmra.mxu1 %vm125_vm2, %v463_v35 }
 0x548   :  { %1648 = vmatpush3.bf16.xpose.msra.mxu1 %v569_v36  ;;  %1649 = vmatprep.mubr.msk.bf16.mxu1 %vm1826_vm0, %v1825_v1 }
 0x549   :  { %1659 = vmatprep.subr.bf16.mxu1 %v1825_v1 }
 0x54a   :  { %v1778_v37 = vpop.eup %1777 }
 0x54b   :  { %v462_v38 = vmul.f32 %v1778_v37, %v1774_v28 }
 0x54d   :  { %v464_v40 = vpack.c.bf16 %v462_v38, %v462_v38 }
 0x54f   :  { %1644 = vmatmul.mubr.msk.bf16.vlgmr.msra.gmra.mxu0 %vm125_vm2, %v464_v40  ;;  %1650 = vmatmul.mubr.msk.bf16.vlgmr.msra.gmra.mxu1 %vm125_vm2, %v562_v41 }
 0x550   :  { %1654 = vmatpush3.bf16.xpose.msra.mxu0 %v619_v42  ;;  %1655 = vmatprep.mubr.msk.bf16.mxu0 %vm1826_vm0, %v1825_v1 }
 0x551   :  { %1665 = vmatprep.subr.bf16.mxu0 %v1825_v1  ;;  %1661 = vmatprep.mubr.msk.bf16.mxu1 %vm1826_vm0, %v1825_v1 }
 0x557   :  { %1656 = vmatmul.mubr.msk.bf16.vlgmr.msra.gmra.mxu0 %vm125_vm2, %v612_v43 }
 0x558   :  { %1667 = vmatprep.mubr.msk.bf16.mxu0 %vm1826_vm0, %v1825_v1 }
 0x607   :  { %v2028_v44 = vpop.f32.mrf.mxu1 }
 0x609   :  { %v1639_v45 = vpop.f32.mrf.mxu1 }
 0x60b   :  { %v510_v46 = vpop.f32.mrf.mxu1 }
 0x60d   :  { %v1640_v47 = vpop.f32.mrf.mxu1 }
 0x60f   :  { %v2030_v48 = vpop.f32.mrf.mxu0  ;;  %v605_v49 = vpop.f32.mrf.mxu1 }
 0x610   :  { %v1722_v50 = vpack.i.bf16 %v2030_v48, %v2028_v44  ;;  %v661_v51 = vsel %vm125_vm2, %v605_v49, -inf }
 0x611   :  { %662 = vmax.xlane.f32.xlu0 %v661_v51  ;;  %v1645_v52 = vpop.f32.mrf.mxu0  ;;  %v1651_v53 = vpop.f32.mrf.mxu1 }
 0x613   :  { %v558_v54 = vpop.f32.mrf.mxu0  ;;  %v608_v55 = vpop.f32.mrf.mxu1 }
 0x615   :  { %v1646_v56 = vpop.f32.mrf.mxu0  ;;  %v1652_v58 = vpop.f32.mrf.mxu1 }
 0x617   :  { %v655_v59 = vpop.f32.mrf.mxu0 }
 0x618   :  { %v664_v60 = vsel %vm125_vm2, %v655_v59, -inf }
 0x619   :  { %665 = vmax.xlane.f32.xlu1 %v664_v60  ;;  %v1657_v62 = vpop.f32.mrf.mxu0 }
 0x61b   :  { %v658_v63 = vpop.f32.mrf.mxu0 }
 0x61d   :  { %v1658_v0 = vpop.f32.mrf.mxu0 }
 0x62a   :  { %685 = vrot.lane.b32.xlu1 %v1946_v10, %s1834_s22 }
 0x62e   :  { %783 = vrot.lane.b32.xlu1 %v1946_v10, %s1835_s23 }
 0x632   :  { %833 = vrot.lane.b32.xlu1 %v1949_v14, %s1835_s23 }
 0x636   :  { %831 = vrot.lane.b32.xlu1 %v1949_v14, %s1836_s24 }
 0x69a   :  { %v663_v2 = vpop.xlane.xlu0 %662 }
 0x69b   :  { %v667_v5 = vsub.f32 %v605_v49, %v663_v2 }
 0x69d   :  { %v669_v6 = vmul.f32 1.442695, %v667_v5 }
 0x69f   :  { %1779 = vpow2.f32 %v669_v6 }
 0x6a2   :  { %v666_v7 = vpop.xlane.xlu1 %665 }
 0x6a3   :  { %v668_v8 = vsub.f32 %v655_v59, %v666_v7 }
 0x6a5   :  { %v671_v9 = vmul.f32 1.442695, %v668_v8 }
 0x6a6   :  { %v686_v11 = vpop.permute.xlu1 %685 }
 0x6a7   :  { %1781 = vpow2.f32 %v671_v9  ;;  %v691_v12 = vsel %vm249_vm3, %v686_v11, 0 }
 0x6a8   :  { %1660 = vmatpush3.bf16.msra.mxu1 %v691_v12 }
 0x6a9   :  { %1671 = vmatprep.subr.bf16.mxu1 %v1825_v1 }
 0x6aa   :  { %v784_v24 = vpop.permute.xlu1 %783 }
 0x6ab   :  { %v789_v26 = vsel %vm125_vm2, %v784_v24, 0 }
 0x6ac   :  { %v1780_v13 = vpop.eup %1779 }
 0x6ad   :  { %v673_v15 = vsel %vm125_vm2, %v1780_v13, 0.0 }
 0x6ae   :  { %674 = vadd.xlane.f32.xlu0 %v673_v15  ;;  %v834_v29 = vpop.permute.xlu1 %833 }
 0x6af   :  { %v839_v32 = vsel %vm125_vm2, %v834_v29, 0 }
 0x6b2   :  { %v832_v33 = vpop.permute.xlu1 %831 }
 0x6b4   :  { %v1782_v16 = vpop.eup %1781 }
 0x6b5   :  { %v676_v17 = vsel %vm125_vm2, %v1782_v16, 0.0 }
 0x6b6   :  { %677 = vadd.xlane.f32.xlu0 %v676_v17  ;;  %v1740_v17 = vld [vmem:[%s2194_s3] sm:$0xff]  }
 0x6cc   :  { %733 = vrot.lane.b32.xlu0 %v1949_v14, %s1834_s22 }
 0x6d0   :  { %781 = vrot.lane.b32.xlu0 %v1946_v10, %s1836_s24 }
 0x737   :  { %v675_v18 = vpop.xlane.xlu0 %674 }
 0x738   :  { %1783 = vrcp.f32 %v675_v18 }
 0x73f   :  { %v678_v19 = vpop.xlane.xlu0 %677 }
 0x740   :  { %1785 = vrcp.f32 %v678_v19 }
 0x743   :  { %v734_v20 = vpop.permute.xlu0 %733 }
 0x744   :  { %v739_v21 = vsel %vm249_vm3, %v734_v20, 0 }
 0x745   :  { %v1784_v22 = vpop.eup %1783  ;;  %1666 = vmatpush3.bf16.msra.mxu0 %v739_v21 }
 0x746   :  { %v681_v23 = vmul.f32 %v1784_v22, %v1780_v13  ;;  %1677 = vmatprep.subr.bf16.mxu0 %v1825_v1 }
 0x747   :  { %v782_v31 = vpop.permute.xlu0 %781 }
 0x748   :  { %v683_v25 = vpack.c.bf16 %v681_v23, %v681_v23 }
 0x74a   :  { %1662 = vmatmul.mubr.msk.bf16.vlgmr.msra.gmra.mxu1 %vm125_vm2, %v683_v25 }
 0x74b   :  { %1672 = vmatpush3.bf16.xpose.msra.mxu1 %v789_v26  ;;  %1673 = vmatprep.mubr.msk.bf16.mxu1 %vm1826_vm0, %v1825_v1 }
 0x74c   :  { %1683 = vmatprep.subr.bf16.mxu1 %v1825_v1 }
 0x74d   :  { %v1786_v27 = vpop.eup %1785 }
 0x74e   :  { %v682_v28 = vmul.f32 %v1786_v27, %v1782_v16 }
 0x750   :  { %v684_v30 = vpack.c.bf16 %v682_v28, %v682_v28 }
 0x752   :  { %1668 = vmatmul.mubr.msk.bf16.vlgmr.msra.gmra.mxu0 %vm125_vm2, %v684_v30  ;;  %1674 = vmatmul.mubr.msk.bf16.vlgmr.msra.gmra.mxu1 %vm125_vm2, %v782_v31 }
 0x753   :  { %1678 = vmatpush3.bf16.xpose.msra.mxu0 %v839_v32  ;;  %1679 = vmatprep.mubr.msk.bf16.mxu0 %vm1826_vm0, %v1825_v1 }
 0x754   :  { %1689 = vmatprep.subr.bf16.mxu0 %v1825_v1  ;;  %1685 = vmatprep.mubr.msk.bf16.mxu1 %vm1826_vm0, %v1825_v1 }
 0x75a   :  { %1680 = vmatmul.mubr.msk.bf16.vlgmr.msra.gmra.mxu0 %vm125_vm2, %v832_v33 }
 0x75b   :  { %1691 = vmatprep.mubr.msk.bf16.mxu0 %vm1826_vm0, %v1825_v1 }
 0x80a   :  { %v727_v34 = vpop.f32.mrf.mxu1 }
 0x80c   :  { %v1663_v35 = vpop.f32.mrf.mxu1 }
 0x80e   :  { %v730_v36 = vpop.f32.mrf.mxu1 }
 0x810   :  { %v1664_v37 = vpop.f32.mrf.mxu1 }
 0x812   :  { %v775_v38 = vpop.f32.mrf.mxu0  ;;  %v825_v39 = vpop.f32.mrf.mxu1 }
 0x813   :  { %v881_v40 = vsel %vm125_vm2, %v825_v39, -inf  ;;  %v1727_v55 = vpack.i.bf16 %v775_v38, %v727_v34 }
 0x814   :  { %882 = vmax.xlane.f32.xlu0 %v881_v40  ;;  %v1669_v41 = vpop.f32.mrf.mxu0  ;;  %v1675_v42 = vpop.f32.mrf.mxu1 }
 0x815   :  { %v1499_v42 = vld [vmem:[%s2195_s4] ss:$0 sm:$0xff] }
 0x816   :  { %v778_v43 = vpop.f32.mrf.mxu0  ;;  %v828_v45 = vpop.f32.mrf.mxu1 }
 0x818   :  { %v1670_v46 = vpop.f32.mrf.mxu0  ;;  %v1676_v47 = vpop.f32.mrf.mxu1 }
 0x81a   :  { %v875_v49 = vpop.f32.mrf.mxu0 }
 0x81b   :  { %v884_v51 = vsel %vm125_vm2, %v875_v49, -inf }
 0x81c   :  { %885 = vmax.xlane.f32.xlu1 %v884_v51  ;;  %v1681_v52 = vpop.f32.mrf.mxu0 }
 0x81e   :  { %v878_v53 = vpop.f32.mrf.mxu0 }
 0x820   :  { %v1682_v54 = vpop.f32.mrf.mxu0 }
 0x82d   :  { %905 = vrot.lane.b32.xlu1 %v1946_v10, %s1837_s25 }
 0x831   :  { %1723 = vrot.lane.b32.xlu1 %v1722_v50, %s1838_s26 }
 0x835   :  { %1728 = vrot.lane.b32.xlu1 %v1727_v55, %s1839_s27 }
 0x89d   :  { %v883_v56 = vpop.xlane.xlu0 %882 }
 0x89e   :  { %v887_v58 = vsub.f32 %v825_v39, %v883_v56 }
 0x8a0   :  { %v889_v59 = vmul.f32 1.442695, %v887_v58 }
 0x8a2   :  { %1787 = vpow2.f32 %v889_v59 }
 0x8a5   :  { %v886_v60 = vpop.xlane.xlu1 %885 }
 0x8a6   :  { %v888_v62 = vsub.f32 %v875_v49, %v886_v60 }
 0x8a8   :  { %v891_v63 = vmul.f32 1.442695, %v888_v62 }
 0x8a9   :  { %v906_v0 = vpop.permute.xlu1 %905 }
 0x8aa   :  { %1789 = vpow2.f32 %v891_v63  ;;  %v911_v10 = vsel %vm249_vm3, %v906_v0, 0 }
 0x8ab   :  { %1684 = vmatpush3.bf16.msra.mxu1 %v911_v10  ;;  %v1741_v10 = vld [vmem:[%s2198_s7 + $0x10] ss:$8 sps:$4 sm:$0xff]  }
 0x8ac   :  { %1695 = vmatprep.subr.bf16.mxu1 %v1825_v1 }
 0x8ad   :  { %v1724_v27 = vpop.permute.xlu1 %1723 }
 0x8ae   :  { %v1726_v29 = vunpack.i.h.bf16 %v1724_v27 }
 0x8af   :  { %v1788_v2 = vpop.eup %1787 }
 0x8b0   :  { %v893_v44 = vsel %vm125_vm2, %v1788_v2, 0.0  ;;  %v1026_v33 = vsel %vm125_vm2, %v1996_v61, %v1726_v29 }
 0x8b1   :  { %894 = vadd.xlane.f32.xlu0 %v893_v44  ;;  %v1729_v28 = vpop.permute.xlu1 %1728  ;;  %v1744_v44 = vld [vmem:[%s2198_s7] ss:$8 sps:$4 sm:$0xff]  }
 0x8b2   :  { %v1731_v30 = vunpack.i.h.bf16 %v1729_v28  ;;  %v1730_v31 = vunpack.i.l.bf16 %v1729_v28 }
 0x8b4   :  { %v1029_v38 = vsel %vm1027_vm4, %v1026_v33, %v1731_v30  ;;  %v1759_v33 = vld [vmem:[%s2200_s9 + $0x48] sm:$0xff]  }
 0x8b7   :  { %v1790_v48 = vpop.eup %1789 }
 0x8b8   :  { %v896_v50 = vsel %vm125_vm2, %v1790_v48, 0.0 }
 0x8b9   :  { %897 = vadd.xlane.f32.xlu0 %v896_v50  ;;  %v1747_v50 = vld [vmem:[%s2200_s9 + $0x78] sm:$0xff]  }
 0x8cf   :  { %953 = vrot.lane.b32.xlu0 %v1949_v14, %s1837_s25  ;;  %v1739_v14 = vld [vmem:[%s2194_s3 + $0x8] sm:$0xff]  }
 0x93a   :  { %v895_v5 = vpop.xlane.xlu0 %894 }
 0x93b   :  { %1791 = vrcp.f32 %v895_v5  ;;  %v1748_v5 = vld [vmem:[%s2200_s9 + $0x38] sm:$0xff]  }
 0x942   :  { %v898_v6 = vpop.xlane.xlu0 %897 }
 0x943   :  { %1793 = vrcp.f32 %v898_v6  ;;  %v1749_v6 = vld [vmem:[%s2200_s9 + $0x70] sm:$0xff]  }
 0x946   :  { %v954_v7 = vpop.permute.xlu0 %953 }
 0x947   :  { %v959_v8 = vsel %vm249_vm3, %v954_v7, 0  ;;  %v1750_v7 = vld [vmem:[%s2200_s9 + $0x30] sm:$0xff]  }
 0x948   :  { %v1792_v9 = vpop.eup %1791  ;;  %1690 = vmatpush3.bf16.msra.mxu0 %v959_v8  ;;  %v1751_v8 = vld [vmem:[%s2200_s9 + $0x68] sm:$0xff]  }
 0x949   :  { %v901_v11 = vmul.f32 %v1792_v9, %v1788_v2  ;;  %v1746_v2 = vld [vmem:[%s2198_s7 + $0x4] ss:$8 sps:$4 sm:$0xff]  }
 0x94a   :  { %v1752_v9 = vld [vmem:[%s2200_s9 + $0x28] sm:$0xff]  }
 0x94b   :  { %v903_v12 = vpack.c.bf16 %v901_v11, %v901_v11  ;;  %v1753_v11 = vld [vmem:[%s2200_s9 + $0x60] sm:$0xff]  }
 0x94d   :  { %1686 = vmatmul.mubr.msk.bf16.vlgmr.msra.gmra.mxu1 %vm125_vm2, %v903_v12  ;;  %v1754_v12 = vld [vmem:[%s2200_s9 + $0x20] sm:$0xff]  }
 0x94e   :  { %1699 = vmatprep.mubr.msk.bf16.mxu1 %vm1826_vm0, %v1825_v1  ;;  %1696 = vmatpush3.bf16.msra.mxu1 %v1739_v14 }
 0x94f   :  { %1697 = vmatprep.subr.bf16.mxu1 %v1825_v1  ;;  %v1725_v1 = vunpack.i.l.bf16 %v1724_v27  ;;  %v1504_v27 = vld [vmem:[%s2197_s6] ss:$0 sm:$0xff] }
 0x950   :  { %v1794_v13 = vpop.eup %1793 }
 0x951   :  { %v902_v15 = vmul.f32 %v1794_v13, %v1790_v48  ;;  %v1025_v34 = vsel %vm125_vm2, %v1994_v57, %v1725_v1  ;;  %v1841_v48 = vmov 0   ;;  %v1755_v13 = vld [vmem:[%s2200_s9 + $0x58] sm:$0xff]  }
 0x952   :  { %1698 = vmatpush3.bf16.msra.mxu1 %v1740_v17  ;;  %v1028_v37 = vsel %vm1027_vm4, %v1025_v34, %v1730_v31  ;;  %v1757_v31 = vld [vmem:[%s2200_s9 + $0x50] sm:$0xff]   ;;  %v1760_v34 = vld [vmem:[%s2200_s9 + $0x8] sm:$0xff]  }
 0x953   :  { %v904_v16 = vpack.c.bf16 %v902_v15, %v902_v15  ;;  %1569 = vmatprep.subr.bf16.mxu1 %v1747_v50  ;;  %v1756_v15 = vld [vmem:[%s2200_s9 + $0x18] sm:$0xff]  }
 0x955   :  { %1692 = vmatmul.mubr.msk.bf16.vlgmr.msra.gmra.mxu0 %vm125_vm2, %v904_v16 }
 0x956   :  { %1220 = vmatprep.mubr.bf16.mxu0 %v1841_v48 }
 0xa0d   :  { %v947_v18 = vpop.f32.mrf.mxu1 }
 0xa0f   :  { %v1687_v19 = vpop.f32.mrf.mxu1 }
 0xa11   :  { %v950_v20 = vpop.f32.mrf.mxu1 }
 0xa13   :  { %v1688_v21 = vpop.f32.mrf.mxu1 }
 0xa15   :  { %v995_v22 = vpop.f32.mrf.mxu0 }
 0xa16   :  { %v1732_v23 = vpack.i.bf16 %v995_v22, %v947_v18 }
 0xa17   :  { %v1693_v24 = vpop.f32.mrf.mxu0 }
 0xa18   :  { %1733 = vrot.lane.b32.xlu0 %v1732_v23, %s1840_s15  ;;  %v1503_v23 = vld [vmem:[%s2196_s5] ss:$0 sm:$0xff] }
 0xa19   :  { %v998_v25 = vpop.f32.mrf.mxu0 }
 0xa1b   :  { %v1694_v26 = vpop.f32.mrf.mxu0 }
 0xa8a   :  { %v1734_v32 = vpop.permute.xlu0 %1733 }
 0xa8b   :  { %v1736_v35 = vunpack.i.h.bf16 %v1734_v32  ;;  %v1735_v36 = vunpack.i.l.bf16 %v1734_v32  ;;  %v1758_v32 = vld [vmem:[%s2200_s9 + $0x10] sm:$0xff]  }
 0xa8d   :  { %v1032_v39 = vsel %vm1030_vm5, %v1029_v38, %v1736_v35  ;;  %v1031_v40 = vsel %vm1030_vm5, %v1028_v37, %v1735_v36  ;;  %v1761_v35 = vld [vmem:[%s2200_s9 + $0x40] sm:$0xff]   ;;  %v1155_v37 = vlaneseq }
 0xa8e   :  { %v1033_v41 = vpack.c.bf16 %v1032_v39, %v1031_v40  ;;  %v1762_v36 = vld [vmem:[%s2200_s9] sm:$0xff]  }
 0xa8f   :  { %v1156_v38 = vshrl.u32 %v1155_v37, 7 }
 0xa90   :  { %1700 = vmatmul.mubr.msk.bf16.vlgmr.msra.gmra.mxu1 %vm72_vm1, %v1033_v41  ;;  %v1153_v41 = vld [vmem:[%s2199_s8] sm:$0x3] }
 0xa91   :  { %1570 = vmatpush3.bf16.msra.mxu1 %v1748_v5  ;;  %v1161_v39 = vsub.s32 1, %v1156_v38  ;;  %v1157_v40 = vsub.s32 0, %v1156_v38 }
 0xa92   :  { %1571 = vmatprep.subr.bf16.mxu1 %v1749_v6 }
 0xa95   :  { %1572 = vmatpush3.bf16.msra.mxu1 %v1750_v7 }
 0xa96   :  { %1573 = vmatprep.subr.bf16.mxu1 %v1751_v8 }
 0xa99   :  { %1574 = vmatpush3.bf16.msra.mxu1 %v1752_v9 }
 0xa9a   :  { %1575 = vmatprep.subr.bf16.mxu1 %v1753_v11 }
 0xa9d   :  { %1576 = vmatpush3.bf16.msra.mxu1 %v1754_v12 }
 0xa9e   :  { %1577 = vmatprep.subr.bf16.mxu1 %v1755_v13 }
 0xaa1   :  { %1578 = vmatpush3.bf16.msra.mxu1 %v1756_v15 }
 0xaa2   :  { %1579 = vmatprep.subr.bf16.mxu1 %v1757_v31 }
 0xaa5   :  { %1580 = vmatpush3.bf16.msra.mxu1 %v1758_v32 }
 0xaa6   :  { %1581 = vmatprep.subr.bf16.mxu1 %v1759_v33 }
 0xaa9   :  { %1582 = vmatpush3.bf16.msra.mxu1 %v1760_v34 }
 0xaaa   :  { %1583 = vmatprep.subr.bf16.mxu1 %v1761_v35 }
 0xaad   :  { %1584 = vmatpush3.bf16.msra.mxu1 %v1762_v36 }
 0xb50   :  { %v1094_v43 = vpop.f32.mrf.mxu1 }
 0xb51   :  { %v1095_v45 = vadd.f32 %v1499_v42, %v1094_v43  ;;  %v1162_v43 = vrot.slane %v1153_v41, %v1161_v39 }
 0xb52   :  { %v1701_v46 = vpop.f32.mrf.mxu1 }
 0xb53   :  { %v1101_v61 = vadd.f32 %v1095_v45, %v1927_v3  ;;  %v1158_v45 = vrot.slane %v1153_v41, %v1157_v40 }
 0xb54   :  { %v1097_v47 = vpop.f32.mrf.mxu1 }
 0xb55   :  { %v1098_v57 = vadd.f32 %v1499_v42, %v1097_v47  ;;  %v1105_v49 = vsel %vm72_vm1, %v1101_v61, 0.0 }
 0xb56   :  { %1106 = vadd.xlane.f32.xlu1 %v1105_v49  ;;  %v1702_v51 = vpop.f32.mrf.mxu1 }
 0xb57   :  { %v1102_v52 = vadd.f32 %v1098_v57, %v1932_v4  ;;  %v1743_v4 = vld [vmem:[%s2198_s7 + $0x14] ss:$8 sps:$4 sm:$0xff]  }
 0xb58   :  { %1200 = vmatprep.subr.bf16.mxu0 %v1743_v4 }
 0xb59   :  { %v1108_v53 = vsel %vm72_vm1, %v1102_v52, 0.0  ;;  %1201 = vmatpush1.bf16.msra.mxu0 %v1741_v10 }
 0xb5a   :  { %1109 = vadd.xlane.f32.xlu0 %v1108_v53  ;;  %1202 = vmatprep.subr.bf16.mxu0 %v1746_v2 }
 0xb5d   :  { %1203 = vmatpush1.bf16.msra.mxu0 %v1744_v44 }
 0xbdf   :  { %v1107_v54 = vpop.xlane.xlu1 %1106 }
 0xbe0   :  { %v1112_v55 = vmul.f32 0.03125, %v1107_v54 }
 0xbe2   :  { %v1114_v56 = vsub.f32 %v1101_v61, %v1112_v55 }
 0xbe3   :  { %v1110_v58 = vpop.xlane.xlu0 %1109 }
 0xbe4   :  { %v1113_v59 = vmul.f32 0.03125, %v1110_v58  ;;  %v1116_v60 = vmul.f32 %v1114_v56, %v1114_v56 }
 0xbe6   :  { %v1115_v62 = vsub.f32 %v1102_v52, %v1113_v59  ;;  %v1118_v3 = vsel %vm72_vm1, %v1116_v60, 0.0 }
 0xbe7   :  { %1119 = vadd.xlane.f32.xlu0 %v1118_v3 }
 0xbe8   :  { %v1117_v63 = vmul.f32 %v1115_v62, %v1115_v62 }
 0xbea   :  { %v1121_v0 = vsel %vm72_vm1, %v1117_v63, 0.0 }
 0xbeb   :  { %1122 = vadd.xlane.f32.xlu1 %v1121_v0 }
 0xc70   :  { %v1120_v16 = vpop.xlane.xlu0 %1119 }
 0xc71   :  { %v1124_v14 = vmul.f32 0.03125, %v1120_v16 }
 0xc73   :  { %v1126_v17 = vadd.f32 1e-05, %v1124_v14 }
 0xc74   :  { %v1123_v18 = vpop.xlane.xlu1 %1122 }
 0xc75   :  { %1795 = vrsqrt.f32 %v1126_v17  ;;  %v1125_v19 = vmul.f32 0.03125, %v1123_v18 }
 0xc77   :  { %v1127_v20 = vadd.f32 1e-05, %v1125_v19 }
 0xc79   :  { %1797 = vrsqrt.f32 %v1127_v20 }
 0xc82   :  { %v1796_v21 = vpop.eup %1795 }
 0xc83   :  { %v1130_v22 = vmul.f32 %v1796_v21, %v1114_v56 }
 0xc85   :  { %v1138_v26 = vmul.f32 %v1503_v23, %v1130_v22 }
 0xc86   :  { %v1798_v24 = vpop.eup %1797 }
 0xc87   :  { %v1131_v25 = vmul.f32 %v1798_v24, %v1115_v62  ;;  %v1146_v29 = vadd.f32 %v1504_v27, %v1138_v26  ;;  %v1510_v62 = vld [vmem:[%s2201_s10] ss:$0 sm:$0xff] }
 0xc89   :  { %v1139_v28 = vmul.f32 %v1503_v23, %v1131_v25  ;;  %v1527_v25 = vld [vmem:[%s2202_s11] ss:$0 sm:$0xff] }
 0xc8b   :  { %v1147_v1 = vadd.f32 %v1504_v27, %v1139_v28  ;;  %v1528_v27 = vld [vmem:[%s2203_s12] ss:$0 sm:$0xff] }
 0xc8d   :  { %v1148_v30 = vpack.c.bf16 %v1147_v1, %v1146_v29 }
 0xc8f   :  { %1509 = vmatmul.mubr.msk.bf16.vlgmr.msra.gmra.mxu0 %vm72_vm1, %v1148_v30 }
 0xd4f   :  { %v1222_v42 = vpop.f32.mrf.mxu0 }
 0xd50   :  { %v1223_v49 = vadd.f32 %v1222_v42, %v1158_v45 }
 0xd51   :  { %v1224_v46 = vpop.f32.mrf.mxu0 }
 0xd52   :  { %v1225_v47 = vadd.f32 %v1224_v46, %v1162_v43  ;;  %v1231_v56 = vmax.f32 %v1223_v49, 0.0 }
 0xd53   :  { %v1226_v61 = vpop.f32.mrf.mxu0 }
 0xd54   :  { %v1227_v57 = vadd.f32 %v1226_v61, %v1158_v45  ;;  %v1232_v54 = vmax.f32 %v1225_v47, 0.0 }
 0xd55   :  { %v1228_v51 = vpop.f32.mrf.mxu0 }
 0xd56   :  { %v1229_v52 = vadd.f32 %v1228_v51, %v1162_v43  ;;  %v1233_v53 = vmax.f32 %v1227_v57, 0.0 }
 0xd58   :  { %v1234_v55 = vmax.f32 %v1229_v52, 0.0  ;;  %v1235_v59 = vpack.c.bf16 %v1233_v53, %v1231_v56 }
 0xd5a   :  { %v1236_v58 = vpack.c.bf16 %v1234_v55, %v1232_v54 }
 0xd5c   :  { %1404 = vmatprep.mubr.bf16.mxu1 %v1236_v58 }
 0xd5d   :  { %1405 = vmatmul.mubr.bf16.vlgmr.msra.gmra.mxu1 %v1235_v59 }
 0xe1d   :  { %v1585_v60 = vpop.f32.mrf.mxu1 }
 0xe1f   :  { %v1586_v3 = vpop.f32.mrf.mxu1 }
 0xe20   :  { %v1587_v63 = vadd.f32 %v1586_v3, %v1585_v60 }
 0xe21   :  { %v1588_v0 = vpop.f32.mrf.mxu1 }
 0xe22   :  { %v1407_v4 = vadd.f32 %v1587_v63, %v1510_v62 }
 0xe23   :  { %v1589_v10 = vpop.f32.mrf.mxu1 }
 0xe24   :  { %v1590_v2 = vadd.f32 %v1589_v10, %v1588_v0  ;;  %v1413_v44 = vadd.f32 %v1407_v4, %v1146_v29 }
 0xe26   :  { %v1410_v48 = vadd.f32 %v1590_v2, %v1510_v62  ;;  %v1417_v50 = vsel %vm72_vm1, %v1413_v44, 0.0 }
 0xe27   :  { %1418 = vadd.xlane.f32.xlu0 %v1417_v50 }
 0xe28   :  { %v1414_v5 = vadd.f32 %v1410_v48, %v1147_v1 }
 0xe2a   :  { %v1420_v6 = vsel %vm72_vm1, %v1414_v5, 0.0 }
 0xe2b   :  { %1421 = vadd.xlane.f32.xlu1 %v1420_v6 }
 0xeb0   :  { %v1419_v7 = vpop.xlane.xlu0 %1418 }
 0xeb1   :  { %v1423_v8 = vmul.f32 0.03125, %v1419_v7 }
 0xeb3   :  { %v1425_v9 = vsub.f32 %v1413_v44, %v1423_v8 }
 0xeb4   :  { %v1422_v11 = vpop.xlane.xlu1 %1421 }
 0xeb5   :  { %v1424_v12 = vmul.f32 0.03125, %v1422_v11  ;;  %v1427_v13 = vmul.f32 %v1425_v9, %v1425_v9 }
 0xeb7   :  { %v1426_v15 = vsub.f32 %v1414_v5, %v1424_v12  ;;  %v1429_v16 = vsel %vm72_vm1, %v1427_v13, 0.0 }
 0xeb8   :  { %1430 = vadd.xlane.f32.xlu0 %v1429_v16 }
 0xeb9   :  { %v1428_v14 = vmul.f32 %v1426_v15, %v1426_v15 }
 0xebb   :  { %v1432_v17 = vsel %vm72_vm1, %v1428_v14, 0.0 }
 0xebc   :  { %1433 = vadd.xlane.f32.xlu1 %v1432_v17 }
 0xf41   :  { %v1431_v18 = vpop.xlane.xlu0 %1430 }
 0xf42   :  { %v1435_v19 = vmul.f32 0.03125, %v1431_v18 }
 0xf44   :  { %v1437_v20 = vadd.f32 1e-05, %v1435_v19 }
 0xf45   :  { %v1434_v21 = vpop.xlane.xlu1 %1433 }
 0xf46   :  { %1799 = vrsqrt.f32 %v1437_v20  ;;  %v1436_v22 = vmul.f32 0.03125, %v1434_v21 }
 0xf48   :  { %v1438_v23 = vadd.f32 1e-05, %v1436_v22 }
 0xf4a   :  { %1801 = vrsqrt.f32 %v1438_v23 }
 0xf53   :  { %v1800_v24 = vpop.eup %1799 }
 0xf54   :  { %v1441_v26 = vmul.f32 %v1800_v24, %v1425_v9 }
 0xf56   :  { %v1449_v28 = vmul.f32 %v1527_v25, %v1441_v26 }
 0xf57   :  { %v1802_v29 = vpop.eup %1801 }
 0xf58   :  { %v1442_v1 = vmul.f32 %v1802_v29, %v1426_v15  ;;  %v1457_v30 = vadd.f32 %v1528_v27, %v1449_v28 }
 0xf5a   :  { %v1450_v31 = vmul.f32 %v1527_v25, %v1442_v1  ;;  %1459 = vst.msk [vmem:[#allocation2] sm:$0xff] %vm72_vm1, %v1457_v30 }
 0xf5c   :  { %v1458_v32 = vadd.f32 %v1528_v27, %v1450_v31 }
 0xf5e   :  { %1460 = vst.msk [vmem:[#allocation2 + $0x8] sm:$0xff] %vm72_vm1, %v1458_v32 }
 0xf5f   :  { %1814 = shalt.err (!%p1811_p4)
}
 0xf60   :  { %s1843_s11 = smov 128  }
 0xf61   :  { %1472 = dma.vmem_to_hbm [thread:$0]  %s1467_s17, 256, %s2204_s13, [#allocation3], %s1843_s11, %s1843_s11, %s1838_s26  }
 0xf62   :  { %1823 = dma.done.wait [#allocation3], 256  }
 0xf63   :  { %1824 = vsyncadd [#allocation3], 4294967040 }
 0xf64   :  { %1476 = vsyncpa [#allocation3], 1 }

</bundles_post_ra>
